<compile_context>
chip_gen: v5e
topology: v5e:2x2
jax: 0.10.0
libtpu: 0.0.40
codegen_flags: <defaults>
</compile_context>

<pallas_src>
import functools

import jax
import jax.numpy as jnp
from jax.experimental import pallas as pl
from jax.experimental.pallas import tpu as pltpu

INPUT_DIM = 2
HIDDEN_DIM = 50
OUTPUT_DIM = 3
NUM_LAYERS = 5      # number of hidden Linear+Tanh blocks in self.net
MAX_TILE_N = 8192   # max collocation points per grid step (multiple of 128)


def _round_up(x, m):
    return ((x + m - 1) // m) * m


def _choose_tile(n, max_tile=MAX_TILE_N):
    """Lane-dense tile: as large as possible (amortize per-step overhead), but
    keep the grid >= 2 steps when N allows so v7x's second TensorCore gets work."""
    n128 = _round_up(max(n, 1), 128)
    if n128 <= 256:
        return n128
    return min(max_tile, _round_up(pl.cdiv(n128, 2), 128))


def _mlp_kernel(num_layers, use_bf16, xt_ref, w0_ref, b0_ref,
                w_ref, b_ref, wo_ref, bo_ref, out_ref):
    # Feature-major, lane-dense: activations are (H, T) with T = tile size.
    x = xt_ref[0:1, :]                   # (1, T) f32
    t = xt_ref[1:2, :]                   # (1, T) f32
    w0 = w0_ref[...]                     # (H, 2) f32   (PyTorch (out, in) layout)
    b0 = b0_ref[...]                     # (H, 1) f32

    # ini_net: Linear(2, H) + Tanh.  K=2 is a degenerate MXU contraction, so
    # compute it as two VPU broadcast multiply-adds instead of a matmul.
    h = jnp.tanh(w0[:, 0:1] * x + w0[:, 1:2] * t + b0)          # (H, T) f32

    if use_bf16:
        # bf16 hidden chain: bf16 MXU inputs, f32 accumulate, f32 bias add, then
        # tanh on the bf16-cast value (EUP packs 2 elems/lane on v6e/v7x).
        h = h.astype(jnp.bfloat16)

    # net: num_layers x (Linear(H, H) + Tanh), static Python unroll.
    for l in range(num_layers):
        z = jnp.dot(w_ref[l], h, preferred_element_type=jnp.float32) + b_ref[l]
        h = jnp.tanh(z.astype(jnp.bfloat16)) if use_bf16 else jnp.tanh(z)

    # out_net: Linear(H, O), no activation.  Lane-dense (O, T) store.
    out = jnp.dot(wo_ref[...], h, preferred_element_type=jnp.float32) + bo_ref[...]
    out_ref[...] = out.astype(out_ref.dtype)


def init_params(key, input_dim=INPUT_DIM, hidden_dim=HIDDEN_DIM,
                output_dim=OUTPUT_DIM, num_layers=NUM_LAYERS):
    """nn.Linear-style U(-1/sqrt(fan_in), +) init, weights in (fan_out, fan_in)."""
    def linear(key, fan_in, fan_out):
        kw, kb = jax.random.split(key)
        bound = 1.0 / jnp.sqrt(jnp.float32(fan_in))
        w = jax.random.uniform(kw, (fan_out, fan_in), jnp.float32, -bound, bound)
        b = jax.random.uniform(kb, (fan_out, 1), jnp.float32, -bound, bound)
        return w, b

    keys = jax.random.split(key, num_layers + 2)
    w0, b0 = linear(keys[0], input_dim, hidden_dim)
    ws, bs = [], []
    for l in range(num_layers):
        w, b = linear(keys[1 + l], hidden_dim, hidden_dim)
        ws.append(w)
        bs.append(b)
    w_stack = jnp.stack(ws)              # (L, H, H)
    b_stack = jnp.stack(bs)              # (L, H, 1)
    wo, bo = linear(keys[-1], hidden_dim, output_dim)
    return (w0, b0, w_stack, b_stack, wo, bo)


def pinn_forward(x, t, params, *, tile=None, use_bf16=False, points_major=False):
    """x, t: (N,) arrays.

    Returns (3, N) float32 (feature-major, kernel-native, no extra HBM pass) by
    default; points_major=True returns the PyTorch (N, 3) layout (same values,
    one extra transpose).
    """
    w0, b0, w_stack, b_stack, wo, bo = params
    hidden_dim, input_dim = w0.shape
    num_layers = w_stack.shape[0]
    output_dim = wo.shape[0]

    n = x.shape[0]
    if tile is None:
        tile = _choose_tile(n)
    n_pad = pl.cdiv(n, tile) * tile

    # One lane-dense (2, N_pad) input (single DMA stream per grid step).  Padded
    # tail columns compute tanh(b0)-seeded garbage through the stack and are
    # sliced off below -- harmless, never read.
    xt = jnp.stack([x.astype(jnp.float32), t.astype(jnp.float32)])   # (2, N)
    if n_pad != n:
        xt = jnp.pad(xt, ((0, 0), (0, n_pad - n)))

    wdt = jnp.bfloat16 if use_bf16 else jnp.float32
    w_stack_c = w_stack.astype(wdt)
    wo_c = wo.astype(wdt)

    kernel = functools.partial(_mlp_kernel, num_layers, use_bf16)
    grid = (n_pad // tile,)

    out = pl.pallas_call(
        kernel,
        grid=grid,
        in_specs=[
            pl.BlockSpec((2, tile), lambda i: (0, i)),                      # [x; t]
            pl.BlockSpec((hidden_dim, input_dim), lambda i: (0, 0)),        # w0
            pl.BlockSpec((hidden_dim, 1), lambda i: (0, 0)),                # b0
            pl.BlockSpec((num_layers, hidden_dim, hidden_dim),
                         lambda i: (0, 0, 0)),                              # w_stack
            pl.BlockSpec((num_layers, hidden_dim, 1),
                         lambda i: (0, 0, 0)),                              # b_stack
            pl.BlockSpec((output_dim, hidden_dim), lambda i: (0, 0)),       # wo
            pl.BlockSpec((output_dim, 1), lambda i: (0, 0)),                # bo
        ],
        out_specs=pl.BlockSpec((output_dim, tile), lambda i: (0, i)),
        out_shape=jax.ShapeDtypeStruct((output_dim, n_pad), jnp.float32),
        compiler_params=pltpu.CompilerParams(
            dimension_semantics=("parallel",),
            vmem_limit_bytes=32 * 1024 * 1024),
    )(xt, w0, b0, w_stack_c, b_stack, wo_c, bo)

    if n_pad != n:
        out = out[:, :n]
    # Feature-major (3, N) is kernel-native; transpose only on explicit request.
    return out.T if points_major else out


def pinn_forward_ref(x, t, params, *, use_bf16=False):
    """Pure-JAX reference performing the same math; returns (3, N) feature-major."""
    w0, b0, w_stack, b_stack, wo, bo = params
    prec = jax.lax.Precision.HIGHEST
    xr = x.astype(jnp.float32).reshape(1, -1)
    tr = t.astype(jnp.float32).reshape(1, -1)
    h = jnp.tanh(w0[:, 0:1] * xr + w0[:, 1:2] * tr + b0)
    if use_bf16:
        h = h.astype(jnp.bfloat16)
    for l in range(w_stack.shape[0]):
        w = w_stack[l].astype(jnp.bfloat16) if use_bf16 else w_stack[l]
        z = jnp.dot(w, h, preferred_element_type=jnp.float32, precision=prec) + b_stack[l]
        h = jnp.tanh(z.astype(jnp.bfloat16)) if use_bf16 else jnp.tanh(z)
    woc = wo.astype(jnp.bfloat16) if use_bf16 else wo
    out = jnp.dot(woc, h, preferred_element_type=jnp.float32, precision=prec) + bo
    return out


if __name__ == "__main__":
    key = jax.random.PRNGKey(0)
    kx, kt, kp = jax.random.split(key, 3)

    N = 300  # small collocation-point count; pads to a 2-step grid of 256-wide tiles
    x = jax.random.normal(kx, (N,), jnp.float32)
    t = jax.random.normal(kt, (N,), jnp.float32)
    params = init_params(kp)

    # Default f32 path (matches the PyTorch f32 module).
    out = jax.block_until_ready(pinn_forward(x, t, params))
    ref = pinn_forward_ref(x, t, params)
    assert out.shape == (OUTPUT_DIM, N), out.shape
    max_err = jnp.max(jnp.abs(out - ref))
    assert jnp.allclose(out, ref, atol=1e-4, rtol=1e-4), max_err

    # PyTorch-layout (N, 3) output path.
    out_pm = jax.block_until_ready(pinn_forward(x, t, params, points_major=True))
    assert out_pm.shape == (N, OUTPUT_DIM), out_pm.shape
    assert jnp.allclose(out_pm, out.T)

    # Optional bf16 activation-chain path (v6e/v7x EUP packing); bf16 tolerance.
    out_bf = jax.block_until_ready(pinn_forward(x, t, params, use_bf16=True))
    ref_bf = pinn_forward_ref(x, t, params, use_bf16=True)
    max_err_bf = jnp.max(jnp.abs(out_bf - ref_bf.astype(jnp.float32)))
    assert jnp.allclose(out_bf, ref_bf.astype(jnp.float32),
                        atol=5e-2, rtol=5e-2), max_err_bf

    print("KERNEL_OK")
</pallas_src>

<mosaic_0001>
module attributes {stable_mosaic.version = 11 : i64} {
  func.func @_mlp_kernel(%arg0: i32, %arg1: memref<2x256xf32, #tpu.memory_space<vmem>>, %arg2: memref<50x2xf32, #tpu.memory_space<vmem>>, %arg3: memref<50x1xf32, #tpu.memory_space<vmem>>, %arg4: memref<5x50x50xf32, #tpu.memory_space<vmem>>, %arg5: memref<5x50x1xf32, #tpu.memory_space<vmem>>, %arg6: memref<3x50xf32, #tpu.memory_space<vmem>>, %arg7: memref<3x1xf32, #tpu.memory_space<vmem>>, %arg8: memref<3x256xf32, #tpu.memory_space<vmem>>) attributes {dimension_semantics = [#tpu.dimension_semantics<parallel>], iteration_bounds = array<i64: 2>, scalar_prefetch = 0 : i64, scratch_operands = 0 : i64, tpu.core_type = #tpu.core_type<tc>, window_params = [{transform_indices = @transform_0, window_bounds = array<i64: 2, 256>}, {pipeline_mode = #tpu.pipeline_mode<synchronous>, transform_indices = @transform_1, window_bounds = array<i64: 50, 2>}, {pipeline_mode = #tpu.pipeline_mode<synchronous>, transform_indices = @transform_2, window_bounds = array<i64: 50, 1>}, {pipeline_mode = #tpu.pipeline_mode<synchronous>, transform_indices = @transform_3, window_bounds = array<i64: 5, 50, 50>}, {pipeline_mode = #tpu.pipeline_mode<synchronous>, transform_indices = @transform_4, window_bounds = array<i64: 5, 50, 1>}, {pipeline_mode = #tpu.pipeline_mode<synchronous>, transform_indices = @transform_5, window_bounds = array<i64: 3, 50>}, {pipeline_mode = #tpu.pipeline_mode<synchronous>, transform_indices = @transform_6, window_bounds = array<i64: 3, 1>}, {transform_indices = @transform_7, window_bounds = array<i64: 3, 256>}]} {
    %c0 = arith.constant 0 : index
    %c0_0 = arith.constant 0 : index
    %0 = vector.load %arg1[%c0, %c0_0] : memref<2x256xf32, #tpu.memory_space<vmem>>, vector<1x256xf32>
    %c1 = arith.constant 1 : index
    %c0_1 = arith.constant 0 : index
    %1 = vector.load %arg1[%c1, %c0_1] : memref<2x256xf32, #tpu.memory_space<vmem>>, vector<1x256xf32>
    %c0_2 = arith.constant 0 : index
    %c0_3 = arith.constant 0 : index
    %2 = vector.load %arg2[%c0_2, %c0_3] : memref<50x2xf32, #tpu.memory_space<vmem>>, vector<50x2xf32>
    %c0_4 = arith.constant 0 : index
    %c0_5 = arith.constant 0 : index
    %3 = vector.load %arg3[%c0_4, %c0_5] : memref<50x1xf32, #tpu.memory_space<vmem>>, vector<50x1xf32>
    %4 = vector.extract_strided_slice %2 {offsets = [0, 0], sizes = [50, 1], strides = [1, 1]} : vector<50x2xf32> to vector<50x1xf32>
    %5 = vector.broadcast %4 : vector<50x1xf32> to vector<50x256xf32>
    %6 = vector.broadcast %0 : vector<1x256xf32> to vector<50x256xf32>
    %7 = arith.mulf %5, %6 : vector<50x256xf32>
    %8 = vector.extract_strided_slice %2 {offsets = [0, 1], sizes = [50, 1], strides = [1, 1]} : vector<50x2xf32> to vector<50x1xf32>
    %9 = vector.broadcast %8 : vector<50x1xf32> to vector<50x256xf32>
    %10 = vector.broadcast %1 : vector<1x256xf32> to vector<50x256xf32>
    %11 = arith.mulf %9, %10 : vector<50x256xf32>
    %12 = arith.addf %7, %11 : vector<50x256xf32>
    %13 = vector.broadcast %3 : vector<50x1xf32> to vector<50x256xf32>
    %14 = arith.addf %12, %13 : vector<50x256xf32>
    %15 = math.tanh %14 : vector<50x256xf32>
    %c0_6 = arith.constant 0 : index
    %c0_7 = arith.constant 0 : index
    %c0_8 = arith.constant 0 : index
    %16 = vector.load %arg4[%c0_6, %c0_7, %c0_8] : memref<5x50x50xf32, #tpu.memory_space<vmem>>, vector<1x50x50xf32>
    %17 = vector.shape_cast %16 : vector<1x50x50xf32> to vector<50x50xf32>
    %cst = arith.constant dense<0.000000e+00> : vector<50x256xf32>
    %18 = tpu.matmul %17, %15, %cst {dimension_numbers = #tpu.dot_dimension_numbers<[1], [0], [0], [1], [0, 0, 1, 1], [], []>} : vector<50x50xf32>, vector<50x256xf32>, vector<50x256xf32> -> vector<50x256xf32>
    %c0_9 = arith.constant 0 : index
    %c0_10 = arith.constant 0 : index
    %c0_11 = arith.constant 0 : index
    %19 = vector.load %arg5[%c0_9, %c0_10, %c0_11] : memref<5x50x1xf32, #tpu.memory_space<vmem>>, vector<1x50x1xf32>
    %20 = vector.shape_cast %19 : vector<1x50x1xf32> to vector<50x1xf32>
    %21 = vector.broadcast %20 : vector<50x1xf32> to vector<50x256xf32>
    %22 = arith.addf %18, %21 : vector<50x256xf32>
    %23 = math.tanh %22 : vector<50x256xf32>
    %c1_12 = arith.constant 1 : index
    %c0_13 = arith.constant 0 : index
    %c0_14 = arith.constant 0 : index
    %24 = vector.load %arg4[%c1_12, %c0_13, %c0_14] : memref<5x50x50xf32, #tpu.memory_space<vmem>>, vector<1x50x50xf32>
    %25 = vector.shape_cast %24 : vector<1x50x50xf32> to vector<50x50xf32>
    %cst_15 = arith.constant dense<0.000000e+00> : vector<50x256xf32>
    %26 = tpu.matmul %25, %23, %cst_15 {dimension_numbers = #tpu.dot_dimension_numbers<[1], [0], [0], [1], [0, 0, 1, 1], [], []>} : vector<50x50xf32>, vector<50x256xf32>, vector<50x256xf32> -> vector<50x256xf32>
    %c1_16 = arith.constant 1 : index
    %c0_17 = arith.constant 0 : index
    %c0_18 = arith.constant 0 : index
    %27 = vector.load %arg5[%c1_16, %c0_17, %c0_18] : memref<5x50x1xf32, #tpu.memory_space<vmem>>, vector<1x50x1xf32>
    %28 = vector.shape_cast %27 : vector<1x50x1xf32> to vector<50x1xf32>
    %29 = vector.broadcast %28 : vector<50x1xf32> to vector<50x256xf32>
    %30 = arith.addf %26, %29 : vector<50x256xf32>
    %31 = math.tanh %30 : vector<50x256xf32>
    %c2 = arith.constant 2 : index
    %c0_19 = arith.constant 0 : index
    %c0_20 = arith.constant 0 : index
    %32 = vector.load %arg4[%c2, %c0_19, %c0_20] : memref<5x50x50xf32, #tpu.memory_space<vmem>>, vector<1x50x50xf32>
    %33 = vector.shape_cast %32 : vector<1x50x50xf32> to vector<50x50xf32>
    %cst_21 = arith.constant dense<0.000000e+00> : vector<50x256xf32>
    %34 = tpu.matmul %33, %31, %cst_21 {dimension_numbers = #tpu.dot_dimension_numbers<[1], [0], [0], [1], [0, 0, 1, 1], [], []>} : vector<50x50xf32>, vector<50x256xf32>, vector<50x256xf32> -> vector<50x256xf32>
    %c2_22 = arith.constant 2 : index
    %c0_23 = arith.constant 0 : index
    %c0_24 = arith.constant 0 : index
    %35 = vector.load %arg5[%c2_22, %c0_23, %c0_24] : memref<5x50x1xf32, #tpu.memory_space<vmem>>, vector<1x50x1xf32>
    %36 = vector.shape_cast %35 : vector<1x50x1xf32> to vector<50x1xf32>
    %37 = vector.broadcast %36 : vector<50x1xf32> to vector<50x256xf32>
    %38 = arith.addf %34, %37 : vector<50x256xf32>
    %39 = math.tanh %38 : vector<50x256xf32>
    %c3 = arith.constant 3 : index
    %c0_25 = arith.constant 0 : index
    %c0_26 = arith.constant 0 : index
    %40 = vector.load %arg4[%c3, %c0_25, %c0_26] : memref<5x50x50xf32, #tpu.memory_space<vmem>>, vector<1x50x50xf32>
    %41 = vector.shape_cast %40 : vector<1x50x50xf32> to vector<50x50xf32>
    %cst_27 = arith.constant dense<0.000000e+00> : vector<50x256xf32>
    %42 = tpu.matmul %41, %39, %cst_27 {dimension_numbers = #tpu.dot_dimension_numbers<[1], [0], [0], [1], [0, 0, 1, 1], [], []>} : vector<50x50xf32>, vector<50x256xf32>, vector<50x256xf32> -> vector<50x256xf32>
    %c3_28 = arith.constant 3 : index
    %c0_29 = arith.constant 0 : index
    %c0_30 = arith.constant 0 : index
    %43 = vector.load %arg5[%c3_28, %c0_29, %c0_30] : memref<5x50x1xf32, #tpu.memory_space<vmem>>, vector<1x50x1xf32>
    %44 = vector.shape_cast %43 : vector<1x50x1xf32> to vector<50x1xf32>
    %45 = vector.broadcast %44 : vector<50x1xf32> to vector<50x256xf32>
    %46 = arith.addf %42, %45 : vector<50x256xf32>
    %47 = math.tanh %46 : vector<50x256xf32>
    %c4 = arith.constant 4 : index
    %c0_31 = arith.constant 0 : index
    %c0_32 = arith.constant 0 : index
    %48 = vector.load %arg4[%c4, %c0_31, %c0_32] : memref<5x50x50xf32, #tpu.memory_space<vmem>>, vector<1x50x50xf32>
    %49 = vector.shape_cast %48 : vector<1x50x50xf32> to vector<50x50xf32>
    %cst_33 = arith.constant dense<0.000000e+00> : vector<50x256xf32>
    %50 = tpu.matmul %49, %47, %cst_33 {dimension_numbers = #tpu.dot_dimension_numbers<[1], [0], [0], [1], [0, 0, 1, 1], [], []>} : vector<50x50xf32>, vector<50x256xf32>, vector<50x256xf32> -> vector<50x256xf32>
    %c4_34 = arith.constant 4 : index
    %c0_35 = arith.constant 0 : index
    %c0_36 = arith.constant 0 : index
    %51 = vector.load %arg5[%c4_34, %c0_35, %c0_36] : memref<5x50x1xf32, #tpu.memory_space<vmem>>, vector<1x50x1xf32>
    %52 = vector.shape_cast %51 : vector<1x50x1xf32> to vector<50x1xf32>
    %53 = vector.broadcast %52 : vector<50x1xf32> to vector<50x256xf32>
    %54 = arith.addf %50, %53 : vector<50x256xf32>
    %55 = math.tanh %54 : vector<50x256xf32>
    %c0_37 = arith.constant 0 : index
    %c0_38 = arith.constant 0 : index
    %56 = vector.load %arg6[%c0_37, %c0_38] : memref<3x50xf32, #tpu.memory_space<vmem>>, vector<3x50xf32>
    %cst_39 = arith.constant dense<0.000000e+00> : vector<3x256xf32>
    %57 = tpu.matmul %56, %55, %cst_39 {dimension_numbers = #tpu.dot_dimension_numbers<[1], [0], [0], [1], [0, 0, 1, 1], [], []>} : vector<3x50xf32>, vector<50x256xf32>, vector<3x256xf32> -> vector<3x256xf32>
    %c0_40 = arith.constant 0 : index
    %c0_41 = arith.constant 0 : index
    %58 = vector.load %arg7[%c0_40, %c0_41] : memref<3x1xf32, #tpu.memory_space<vmem>>, vector<3x1xf32>
    %59 = vector.broadcast %58 : vector<3x1xf32> to vector<3x256xf32>
    %60 = arith.addf %57, %59 : vector<3x256xf32>
    %c0_42 = arith.constant 0 : index
    %c0_43 = arith.constant 0 : index
    %61 = vector.load %arg8[%c0_42, %c0_43] : memref<3x256xf32, #tpu.memory_space<vmem>>, vector<3x256xf32>
    tpu.vector_store %arg8[%c0_42, %c0_43], %60 {strides = array<i32>} : memref<3x256xf32, #tpu.memory_space<vmem>>, vector<3x256xf32>,
    return
  }
  func.func @transform_0(%arg0: i32) -> (i32, i32) {
    %c0_i32 = arith.constant 0 : i32
    %c0_i32_0 = arith.constant 0 : i32
    return %c0_i32, %arg0 : i32, i32
  }
  func.func @transform_1(%arg0: i32) -> (i32, i32) {
    %c0_i32 = arith.constant 0 : i32
    %c0_i32_0 = arith.constant 0 : i32
    %c0_i32_1 = arith.constant 0 : i32
    return %c0_i32, %c0_i32_0 : i32, i32
  }
  func.func @transform_2(%arg0: i32) -> (i32, i32) {
    %c0_i32 = arith.constant 0 : i32
    %c0_i32_0 = arith.constant 0 : i32
    %c0_i32_1 = arith.constant 0 : i32
    return %c0_i32, %c0_i32_0 : i32, i32
  }
  func.func @transform_3(%arg0: i32) -> (i32, i32, i32) {
    %c0_i32 = arith.constant 0 : i32
    %c0_i32_0 = arith.constant 0 : i32
    %c0_i32_1 = arith.constant 0 : i32
    %c0_i32_2 = arith.constant 0 : i32
    return %c0_i32, %c0_i32_0, %c0_i32_1 : i32, i32, i32
  }
  func.func @transform_4(%arg0: i32) -> (i32, i32, i32) {
    %c0_i32 = arith.constant 0 : i32
    %c0_i32_0 = arith.constant 0 : i32
    %c0_i32_1 = arith.constant 0 : i32
    %c0_i32_2 = arith.constant 0 : i32
    return %c0_i32, %c0_i32_0, %c0_i32_1 : i32, i32, i32
  }
  func.func @transform_5(%arg0: i32) -> (i32, i32) {
    %c0_i32 = arith.constant 0 : i32
    %c0_i32_0 = arith.constant 0 : i32
    %c0_i32_1 = arith.constant 0 : i32
    return %c0_i32, %c0_i32_0 : i32, i32
  }
  func.func @transform_6(%arg0: i32) -> (i32, i32) {
    %c0_i32 = arith.constant 0 : i32
    %c0_i32_0 = arith.constant 0 : i32
    %c0_i32_1 = arith.constant 0 : i32
    return %c0_i32, %c0_i32_0 : i32, i32
  }
  func.func @transform_7(%arg0: i32) -> (i32, i32) {
    %c0_i32 = arith.constant 0 : i32
    %c0_i32_0 = arith.constant 0 : i32
    return %c0_i32, %arg0 : i32, i32
  }
}

</mosaic_0001>

<bundles_post_ra>
// kernel: tpu_custom_call.1
= control target key start
LH: loop header
LB: loop body
LE: loop exit
PB: predicated region body
PF: predicated region fallthrough
CT: control target
= control target key end

     0   :  { %12 = vsyncpa [#allocation3], 0  ;;  %s2426_s0 = inlined_call_operand.vmem [shape: f32[2,512], index: 0, kind: input, shape index: {}]   ;;  %s2427_s1 = inlined_call_operand.vmem [shape: f32[50,2], index: 1, kind: input, shape index: {}]   ;;  %s2428_s2 = inlined_call_operand.vmem [shape: f32[50,1], index: 2, kind: input, shape index: {}]   ;;  %s2429_s3 = inlined_call_operand.vmem [shape: f32[5,50,50], index: 3, kind: input, shape index: {}]   ;;  %s2430_s4 = inlined_call_operand.vmem [shape: f32[5,50,1], index: 4, kind: input, shape index: {}]   ;;  %s2431_s5 = inlined_call_operand.vmem [shape: f32[3,50], index: 5, kind: input, shape index: {}]   ;;  %s2432_s6 = inlined_call_operand.vmem [shape: f32[3,1], index: 6, kind: input, shape index: {}]   ;;  %s2433_s7 = inlined_call_operand.hbm [shape: f32[3,512], index: 7, kind: output, shape index: {}]  }
   0x1   :  { %14 = vsyncpa [#allocation3 + $0x1], 0  ;;  %s1946_s24 = smov 0   ;;  %s1948_s25 = smov 0  }
   0x2   :  { %s1950_s26 = smov 0   ;;  %s1952_s27 = smov 0  }
   0x3 LB: > { %s1967_s28 = sadd.s32 4294967295, %s1902_s27   ;;  %s1454_s29 = sadd.s32 4294967294, %s1902_s27   ;;  %s1902_s27 = sphi %s1952_s27, %s2439_s27   ;;  %s1898_s26 = sphi %s1950_s26, %s2438_s26   ;;  %s1894_s25 = sphi %s1948_s25, %s2437_s25   ;;  %s1890_s24 = sphi %s1946_s24, %s2436_s24  }
   0x4   : > { %s1971_s30 = sadd.s32 1, %s1902_s27   ;;  %s179_s8 = sadd.s32 1, %s1898_s26 }
   0x5   : > { %s176_s9 = ssub.s32 %s1902_s27, %s1971_s30  ;;  %p189_p0 = scmp.ne.s32.totalorder %s1898_s26, %s1894_s25 }
   0x6   : > { %p177_p1 = scmp.eq.s32.totalorder %s176_s9, 0  ;;  %p190_p2 = scmp.eq.s32.totalorder %s1967_s28, 1 }
   0x7   : > { %p195_p3 = scmp.ne.s32.totalorder %s1894_s25, %s1890_s24  ;;  %p196_p4 = scmp.eq.s32.totalorder %s1454_s29, 1 }
   0x8   : > { %s1982_s10 = scalar_select %p177_p1, %s1898_s26, %s179_s8  }
   0x9   : > { %p1984_p5 = por %p190_p2, %p189_p0  ;;  %p1988_p6 = por %p196_p4, %p195_p3 }
   0xa   : > { %p1457_p7 = scmp.ge.s32.totalorder %s1902_s27, 1  ;;  %p241_p8 = scmp.lt.s32.totalorder %s1902_s27, 3 }
   0xc   : > { %p242_p9 = pnand %p1457_p7, %p241_p8 }
   0xd   : > { %s1459_s13 = sshll.u32 (!%p242_p9), %s1967_s28, 1  ;;  %s270_s22 = sand.u32 (!%p242_p9), 1, %s1894_s25  }
   0xe   : > { %245 = sbr.rel (%p242_p9) target bundleno = 1309 (0x51d), region = 48  ;;  %p274_p10 = scmp.lt.s32.totalorder (!%p242_p9), %s1459_s13, 3 }
   0xf   : > { %s1458_s23 = sshll.u32 (!%p242_p9), %s270_s22, 3  ;;  %s1607_s29 = sshll.u32 (!%p242_p9), %s1967_s28, 3 }
  0x10   : > { %s1390_s14 = scalar_lea.hbm (!%p242_p9), %s2433_s7, %s1607_s29  ;;  %s272_s15 = scalar_lea.vmem (!%p242_p9), [#allocation2], %s1458_s23 }
  0x11   : > { %s1379_s28 = scalar_lea.sflag (!%p242_p9), [#allocation3], %s270_s22  ;;  %s1860_s21 = scalar_lea.hbm (!%p242_p9), %s2433_s7, 16 }
  0x13   : > { %v289_v0 = vld [vmem:[%s2427_s1 + $0x30] sm:$0x3]  ;;  %v288_v1 = vld [vmem:[%s2427_s1 + $0x28] sm:$0xff]  ;;  %v287_v2 = vld [vmem:[%s2427_s1 + $0x20] sm:$0xff]  ;;  %v1904_v3 = vmov 0   ;;  %v1905_v4 = vmov 1  }
  0x14   : > { %1667 = vset.pattern.permute.xlu2 %v1904_v3  ;;  %1665 = vset.pattern.permute.xlu1 %v1904_v3  ;;  %v286_v5 = vld [vmem:[%s2427_s1 + $0x18] sm:$0xff]  ;;  %v296_v6 = vld [vmem:[%s2428_s2 + $0x30] sm:$0x3]  ;;  %v295_v8 = vld [vmem:[%s2428_s2 + $0x28] sm:$0xff]  ;;  %s2441_s13 = smov (!%p274_p10, %s1459_s13), 3  ;;  %vm546_vm0 = vcmask 1041408  }
  0x15   : > { %1663 = vset.pattern.permute.xlu0 %v1904_v3  ;;  %324 = vperm.xlu1 %1665, %v288_v1   ;;  %v285_v7 = vld [vmem:[%s2427_s1 + $0x10] sm:$0xff]  ;;  %v284_v9 = vld [vmem:[%s2427_s1 + $0x8] sm:$0xff]  ;;  %v294_v10 = vld [vmem:[%s2428_s2 + $0x20] sm:$0xff]  ;;  %s1460_s20 = sshll.u32 %s2441_s13, 1  ;;  %vm524_vm1 = vcmask 408576   ;;  %s1394_s13 = sshll.u32 %s1390_s14, 4  ;;  %s1395_s13 = int_to_ptr.hbm [resolvable:$true] %s1394_s13 }
  0x16   : > { %329 = vperm.xlu0 %1663, %v289_v0   ;;  %319 = vperm.xlu2 %1667, %v287_v2   ;;  %v283_v11 = vld [vmem:[%s2427_s1] sm:$0xff]  ;;  %v293_v12 = vld [vmem:[%s2428_s2 + $0x18] sm:$0xff]  ;;  %v292_v13 = vld [vmem:[%s2428_s2 + $0x10] sm:$0xff]  ;;  %s277_s16 = scalar_lea.vmem %s2426_s0, %s1460_s20  ;;  %vm1374_vm2 = vcmask 1043456   ;;  %s1854_s17 = sshra.s32 %s1395_s13, 4  ;;  %s1855_s17 = int_to_ptr.hbm [resolvable:$true] %s1854_s17 }
  0x17   : > { %v290_v14 = vld [vmem:[%s2428_s2] sm:$0xff]  ;;  %v291_v15 = vld [vmem:[%s2428_s2 + $0x8] sm:$0xff]  ;;  %v488_v16 = vld [vmem:[%s2430_s4 + $0x30] sm:$0x3]  ;;  %s1856_s18 = scalar_lea.hbm %s1855_s17, 8  ;;  %p1861_p0 = scmp.lt.s32.totalorder %s1855_s17, %s2433_s7 }
  0x18   : > { %v484_v17 = vld [vmem:[%s2430_s4 + $0x10] sm:$0xff]  ;;  %v487_v18 = vld [vmem:[%s2430_s4 + $0x28] sm:$0xff]  ;;  %v486_v19 = vld [vmem:[%s2430_s4 + $0x20] sm:$0xff]  ;;  %p1857_p11 = scmp.ne.s32.totalorder %s1855_s17, %s1856_s18  ;;  %p1862_p1 = scmp.lt.s32.totalorder %s1860_s21, %s1856_s18 }
  0x19   : > { %v1491_v20 = vld [vmem:[%s2430_s4 + $0x68] sm:$0x3]  ;;  %v485_v21 = vld [vmem:[%s2430_s4 + $0x18] sm:$0xff]  ;;  %v1488_v23 = vld [vmem:[%s2430_s4 + $0x50] sm:$0xff] }
  0x1a   : > { %v483_v22 = vld [vmem:[%s2430_s4 + $0x8] sm:$0xff]  ;;  %v482_v24 = vld [vmem:[%s2430_s4] sm:$0xff]  ;;  %v1485_v26 = vld [vmem:[%s2430_s4 + $0x38] sm:$0xff]  ;;  %p1858_p12 = pnand %p1857_p11, %p1984_p5  ;;  %p1863_p2 = por %p1862_p1, %p1861_p0 }
  0x1b   : > { %v1490_v25 = vld [vmem:[%s2430_s4 + $0x60] sm:$0xff]  ;;  %v1489_v27 = vld [vmem:[%s2430_s4 + $0x58] sm:$0xff]  ;;  %v1487_v28 = vld [vmem:[%s2430_s4 + $0x48] sm:$0xff] }
  0x1c   : > { %v1519_v29 = vld [vmem:[%s2430_s4 + $0x90] sm:$0xff]  ;;  %v1486_v30 = vld [vmem:[%s2430_s4 + $0x40] sm:$0xff]  ;;  %v1516_v32 = vld [vmem:[%s2430_s4 + $0x78] sm:$0xff]  ;;  %p1859_p13 = pneg %p1858_p12 }
  0x1d   : > { %1666 = vset.pattern.permute.xlu1 %v1905_v4  ;;  %v1521_v31 = vld [vmem:[%s2430_s4 + $0xa0] sm:$0x3]  ;;  %v1520_v33 = vld [vmem:[%s2430_s4 + $0x98] sm:$0xff]  ;;  %v1518_v35 = vld [vmem:[%s2430_s4 + $0x88] sm:$0xff] }
  0x1e   : > { %1664 = vset.pattern.permute.xlu0 %v1905_v4  ;;  %1668 = vset.pattern.permute.xlu2 %v1905_v4  ;;  %v1550_v36 = vld [vmem:[%s2430_s4 + $0xd0] sm:$0xff]  ;;  %v1517_v37 = vld [vmem:[%s2430_s4 + $0x80] sm:$0xff]  ;;  %v1547_v39 = vld [vmem:[%s2430_s4 + $0xb8] sm:$0xff]  ;;  %p1864_p3 = pnand %p1863_p2, %p1859_p13 }
  0x1f   : > { %376 = vperm.xlu0 %1664, %v289_v0   ;;  %372 = vperm.xlu1 %1666, %v288_v1   ;;  %v1515_v38 = vld [vmem:[%s2430_s4 + $0x70] sm:$0xff]  ;;  %v1551_v41 = vld [vmem:[%s2430_s4 + $0xd8] sm:$0x3]  ;;  %v1549_v44 = vld [vmem:[%s2430_s4 + $0xc8] sm:$0xff] }
  0x20   : > { %368 = vperm.xlu2 %1668, %v287_v2   ;;  %v1581_v45 = vld [vmem:[%s2430_s4 + $0x110] sm:$0x3]  ;;  %v1548_v46 = vld [vmem:[%s2430_s4 + $0xc0] sm:$0xff]  ;;  %v1578_v59 = vld [vmem:[%s2430_s4 + $0xf8] sm:$0xff] }
  0x21   : > { %v1461_v47 = vld [vmem:[%s277_s16 + $0x1] ss:$2 sm:$0x3]  ;;  %v280_v51 = vld [vmem:[%s277_s16] ss:$2 sm:$0x3] }
  0x22   : > { %v2127_v52 = vperm.slane %v1461_v47, 0  ;;  %v2129_v53 = vperm.slane %v1461_v47, 1  ;;  %v2131_v54 = vperm.slane %v280_v51, 0  ;;  %v2133_v55 = vperm.slane %v280_v51, 1  ;;  %v1546_v58 = vld [vmem:[%s2430_s4 + $0xb0] sm:$0xff]  ;;  %v1545_v60 = vld [vmem:[%s2430_s4 + $0xa8] sm:$0xff] }
  0x23   : > { %s1392_s16 = sshll.u32 %s272_s15, 4  ;;  %s1393_s16 = int_to_ptr.vmem [resolvable:$true] %s1392_s16 }
  0x27   : > { %1669 = vset.pattern.permute.xlu1 %v1904_v3  ;;  %364 = vperm.xlu0 %1664, %v286_v5  }
  0x28   : > { %1670 = vset.pattern.permute.xlu2 %v1904_v3  ;;  %444 = vperm.xlu1 %1669, %v296_v6  }
  0x29   : > { %314 = vperm.xlu2 %1670, %v286_v5  }
  0x2f   : > { %360 = vperm.xlu0 %1664, %v285_v7  }
  0x30   : > { %439 = vperm.xlu1 %1669, %v295_v8   ;;  %v1580_v8 = vld [vmem:[%s2430_s4 + $0x108] sm:$0xff] }
  0x31   : > { %309 = vperm.xlu2 %1670, %v285_v7  }
  0x37   : > { %356 = vperm.xlu0 %1664, %v284_v9  }
  0x38   : > { %434 = vperm.xlu1 %1669, %v294_v10   ;;  %v1579_v10 = vld [vmem:[%s2430_s4 + $0x100] sm:$0xff] }
  0x39   : > { %304 = vperm.xlu2 %1670, %v284_v9   ;;  %v1575_v9 = vld [vmem:[%s2430_s4 + $0xe0] sm:$0xff] }
  0x3f   : > { %352 = vperm.xlu0 %1664, %v283_v11  }
  0x40   : > { %429 = vperm.xlu1 %1669, %v293_v12  }
  0x41   : > { %299 = vperm.xlu2 %1670, %v283_v11  }
  0x47   : > { %1671 = vset.pattern.permute.xlu0 %v1904_v3 }
  0x48   : > { %424 = vperm.xlu1 %1669, %v292_v13   ;;  %414 = vperm.xlu0 %1671, %v290_v14  }
  0x49   : > { %419 = vperm.xlu2 %1670, %v291_v15  }
  0x50   : > { %521 = vperm.xlu1 %1669, %v488_v16   ;;  %501 = vperm.xlu0 %1671, %v484_v17  }
  0x51   : > { %516 = vperm.xlu2 %1670, %v487_v18  }
  0x58   : > { %511 = vperm.xlu1 %1669, %v486_v19   ;;  %691 = vperm.xlu0 %1671, %v1491_v20  }
  0x59   : > { %506 = vperm.xlu2 %1670, %v485_v21  }
  0x60   : > { %496 = vperm.xlu1 %1669, %v483_v22   ;;  %676 = vperm.xlu0 %1671, %v1488_v23  }
  0x61   : > { %491 = vperm.xlu2 %1670, %v482_v24  }
  0x68   : > { %686 = vperm.xlu1 %1669, %v1490_v25   ;;  %661 = vperm.xlu0 %1671, %v1485_v26   ;;  %v1577_v26 = vld [vmem:[%s2430_s4 + $0xf0] sm:$0xff] }
  0x69   : > { %681 = vperm.xlu2 %1670, %v1489_v27   ;;  %v1576_v27 = vld [vmem:[%s2430_s4 + $0xe8] sm:$0xff] }
  0x70   : > { %671 = vperm.xlu1 %1669, %v1487_v28   ;;  %849 = vperm.xlu0 %1671, %v1519_v29   ;;  %v2090_v34 = vpop.permute.xlu2 %319 }
  0x71   : > { %666 = vperm.xlu2 %1670, %v1486_v30   ;;  %v345_v21 = vmul.f32 %v2131_v54, %v2090_v34  ;;  %v346_v22 = vmul.f32 %v2133_v55, %v2090_v34 }
  0x78   : > { %859 = vperm.xlu1 %1669, %v1521_v31   ;;  %834 = vperm.xlu0 %1671, %v1516_v32  }
  0x79   : > { %854 = vperm.xlu2 %1670, %v1520_v33  }
  0x7a   : > { %v2108_v40 = vpop.permute.xlu2 %368 }
  0x7b   : > { %v392_v23 = vmul.f32 %v2127_v52, %v2108_v40  ;;  %v393_v24 = vmul.f32 %v2129_v53, %v2108_v40  ;;  %v1316_v40 = vld [vmem:[%s2432_s6] sm:$0x7] }
  0x7d   : > { %v406_v29 = vadd.f32 %v392_v23, %v345_v21  ;;  %v407_v30 = vadd.f32 %v393_v24, %v346_v22  ;;  %v479_v21 = vld [vmem:[%s2429_s3 + $0x20] sm:$0xff]  ;;  %v476_v23 = vld [vmem:[%s2429_s3 + $0x8] sm:$0xff] }
  0x7e   : > { %v480_v24 = vld [vmem:[%s2429_s3 + $0x28] sm:$0xff] }
  0x80   : > { %844 = vperm.xlu1 %1669, %v1518_v35   ;;  %1022 = vperm.xlu0 %1671, %v1550_v36  }
  0x81   : > { %839 = vperm.xlu2 %1670, %v1517_v37  }
  0x83   : > { %v2125_v48 = vpop.permute.xlu2 %314 }
  0x84   : > { %v343_v36 = vmul.f32 %v2131_v54, %v2125_v48  ;;  %v344_v37 = vmul.f32 %v2133_v55, %v2125_v48 }
  0x87   : > { %v325_v42 = vpop.permute.xlu1 %324 }
  0x88   : > { %829 = vperm.xlu1 %1669, %v1515_v38   ;;  %1007 = vperm.xlu0 %1671, %v1547_v39   ;;  %v330_v43 = vpop.permute.xlu0 %329  ;;  %v347_v11 = vmul.f32 %v2131_v54, %v325_v42  ;;  %v348_v12 = vmul.f32 %v2133_v55, %v325_v42 }
  0x89   : > { %1027 = vperm.xlu2 %1670, %v1551_v41   ;;  %v349_v61 = vmul.f32 %v2131_v54, %v330_v43  ;;  %v350_v62 = vmul.f32 %v2133_v55, %v330_v43 }
  0x8b   : > { %v2148_v3 = vpop.permute.xlu2 %309 }
  0x90   : > { %1017 = vperm.xlu1 %1669, %v1549_v44   ;;  %1195 = vperm.xlu0 %1671, %v1581_v45  }
  0x91   : > { %1012 = vperm.xlu2 %1670, %v1548_v46   ;;  %v377_v49 = vpop.permute.xlu0 %376  ;;  %v373_v50 = vpop.permute.xlu1 %372 }
  0x92   : > { %v396_v56 = vmul.f32 %v2127_v52, %v377_v49  ;;  %v397_v57 = vmul.f32 %v2129_v53, %v377_v49  ;;  %v394_v6 = vmul.f32 %v2127_v52, %v373_v50  ;;  %v395_v7 = vmul.f32 %v2129_v53, %v373_v50 }
  0x93   : > { %v305_v25 = vpop.permute.xlu2 %304 }
  0x94   : > { %v410_v0 = vadd.f32 %v396_v56, %v349_v61  ;;  %v411_v1 = vadd.f32 %v397_v57, %v350_v62  ;;  %v408_v14 = vadd.f32 %v394_v6, %v347_v11  ;;  %v409_v15 = vadd.f32 %v395_v7, %v348_v12 }
  0x95   : > { %v339_v56 = vmul.f32 %v2131_v54, %v305_v25  ;;  %v342_v61 = vmul.f32 %v2133_v55, %v2148_v3 }
  0x98   : > { %1002 = vperm.xlu1 %1669, %v1546_v58   ;;  %1180 = vperm.xlu0 %1671, %v1578_v59   ;;  %v340_v59 = vmul.f32 %v2133_v55, %v305_v25  ;;  %v477_v25 = vld [vmem:[%s2429_s3 + $0x10] sm:$0xff] }
  0x99   : > { %997 = vperm.xlu2 %1670, %v1545_v60   ;;  %v365_v63 = vpop.permute.xlu0 %364  ;;  %v341_v60 = vmul.f32 %v2131_v54, %v2148_v3 }
  0x9a   : > { %v445_v2 = vpop.permute.xlu1 %444  ;;  %v390_v38 = vmul.f32 %v2127_v52, %v365_v63  ;;  %v391_v39 = vmul.f32 %v2129_v53, %v365_v63 }
  0x9b   : > { %v459_v4 = vadd.f32 %v445_v2, %v410_v0  ;;  %v460_v5 = vadd.f32 %v445_v2, %v411_v1  ;;  %v300_v41 = vpop.permute.xlu2 %299 }
  0x9c   : > { %v404_v43 = vadd.f32 %v390_v38, %v343_v36  ;;  %v405_v44 = vadd.f32 %v391_v39, %v344_v37  ;;  %v337_v2 = vmul.f32 %v2131_v54, %v300_v41  ;;  %v338_v7 = vmul.f32 %v2133_v55, %v300_v41 }
  0x9d   : > { %1672 = vtanh.f32 %v459_v4 }
  0x9e   : > { %1674 = vtanh.f32 %v460_v5 }
  0xa0   : > { %1190 = vperm.xlu1 %1669, %v1580_v8   ;;  %1165 = vperm.xlu0 %1671, %v1575_v9  }
  0xa1   : > { %1185 = vperm.xlu2 %1670, %v1579_v10   ;;  %v361_v13 = vpop.permute.xlu0 %360 }
  0xa2   : > { %v440_v16 = vpop.permute.xlu1 %439  ;;  %v388_v57 = vmul.f32 %v2127_v52, %v361_v13  ;;  %v389_v58 = vmul.f32 %v2129_v53, %v361_v13 }
  0xa3   : > { %v1673_v17 = vpop.eup %1672  ;;  %v457_v18 = vadd.f32 %v440_v16, %v408_v14  ;;  %v458_v19 = vadd.f32 %v440_v16, %v409_v15  ;;  %v420_v4 = vpop.permute.xlu2 %419 }
  0xa4   : > { %v1675_v20 = vpop.eup %1674  ;;  %1462 = vmatpush.msk.msra.mxu0 %vm546_vm0, %v1673_v17  ;;  %1608 = vmatpush.msk.msra.mxu2 %vm546_vm0, %v1673_v17  ;;  %v402_v5 = vadd.f32 %v388_v57, %v341_v60  ;;  %v403_v6 = vadd.f32 %v389_v58, %v342_v61 }
  0xa5   : > { %1676 = vtanh.f32 %v457_v18  ;;  %1470 = vmatpush.msk.msra.mxu1 %vm546_vm0, %v1675_v20  ;;  %1615 = vmatpush.msk.msra.mxu3 %vm546_vm0, %v1675_v20  ;;  %v475_v20 = vld [vmem:[%s2429_s3] sm:$0xff] }
  0xa6   : > { %1678 = vtanh.f32 %v458_v19 }
  0xa8   : > { %1175 = vperm.xlu1 %1669, %v1577_v26   ;;  %v481_v26 = vld [vmem:[%s2429_s3 + $0x30] sm:$0x3] }
  0xa9   : > { %1170 = vperm.xlu2 %1670, %v1576_v27   ;;  %v357_v28 = vpop.permute.xlu0 %356  ;;  %v478_v27 = vld [vmem:[%s2429_s3 + $0x18] sm:$0xff] }
  0xaa   : > { %v435_v31 = vpop.permute.xlu1 %434  ;;  %v386_v47 = vmul.f32 %v2127_v52, %v357_v28  ;;  %v387_v51 = vmul.f32 %v2129_v53, %v357_v28 }
  0xab   : > { %v1677_v32 = vpop.eup %1676  ;;  %v455_v33 = vadd.f32 %v435_v31, %v406_v29  ;;  %v456_v34 = vadd.f32 %v435_v31, %v407_v30 }
  0xac   : > { %v1679_v35 = vpop.eup %1678  ;;  %563 = vmatpush.msra.mxu0 %v1677_v32  ;;  %1609 = vmatpush.msra.mxu2 %v1677_v32  ;;  %v400_v62 = vadd.f32 %v386_v47, %v339_v56  ;;  %v401_v0 = vadd.f32 %v387_v51, %v340_v59 }
  0xad   : > { %1680 = vtanh.f32 %v455_v33  ;;  %601 = vmatpush.msra.mxu1 %v1679_v35  ;;  %1616 = vmatpush.msra.mxu3 %v1679_v35  ;;  %v517_v35 = vpop.permute.xlu2 %516 }
  0xae   : > { %1682 = vtanh.f32 %v456_v34  ;;  %v449_v11 = vadd.f32 %v420_v4, %v400_v62  ;;  %v450_v15 = vadd.f32 %v420_v4, %v401_v0 }
  0xb0   : > { %1319 = vperm.xlu1 %1669, %v1316_v40  }
  0xb1   : > { %v353_v42 = vpop.permute.xlu0 %352 }
  0xb2   : > { %v430_v45 = vpop.permute.xlu1 %429  ;;  %v384_v63 = vmul.f32 %v2127_v52, %v353_v42  ;;  %v385_v1 = vmul.f32 %v2129_v53, %v353_v42 }
  0xb3   : > { %v1681_v46 = vpop.eup %1680  ;;  %v453_v48 = vadd.f32 %v430_v45, %v404_v43  ;;  %v454_v49 = vadd.f32 %v430_v45, %v405_v44 }
  0xb4   : > { %v1683_v50 = vpop.eup %1682  ;;  %564 = vmatpush.msra.mxu0 %v1681_v46  ;;  %1610 = vmatpush.msra.mxu2 %v1681_v46  ;;  %v398_v3 = vadd.f32 %v384_v63, %v337_v2  ;;  %v399_v52 = vadd.f32 %v385_v1, %v338_v7 }
  0xb5   : > { %1684 = vtanh.f32 %v453_v48  ;;  %602 = vmatpush.msra.mxu1 %v1683_v50  ;;  %1617 = vmatpush.msra.mxu3 %v1683_v50  ;;  %v507_v41 = vpop.permute.xlu2 %506 }
  0xb6   : > { %1686 = vtanh.f32 %v454_v49 }
  0xba   : > { %v425_v8 = vpop.permute.xlu1 %424  ;;  %v415_v9 = vpop.permute.xlu0 %414 }
  0xbb   : > { %v1685_v10 = vpop.eup %1684  ;;  %v451_v12 = vadd.f32 %v425_v8, %v402_v5  ;;  %v452_v13 = vadd.f32 %v425_v8, %v403_v6  ;;  %v447_v53 = vadd.f32 %v415_v9, %v398_v3  ;;  %v448_v54 = vadd.f32 %v415_v9, %v399_v52 }
  0xbc   : > { %v1687_v14 = vpop.eup %1686  ;;  %565 = vmatpush.msra.mxu0 %v1685_v10  ;;  %1611 = vmatpush.msra.mxu2 %v1685_v10 }
  0xbd   : > { %1688 = vtanh.f32 %v451_v12  ;;  %603 = vmatpush.msra.mxu1 %v1687_v14  ;;  %1618 = vmatpush.msra.mxu3 %v1687_v14  ;;  %v492_v1 = vpop.permute.xlu2 %491 }
  0xbe   : > { %1690 = vtanh.f32 %v452_v13 }
  0xbf   : > { %1692 = vtanh.f32 %v449_v11 }
  0xc0   : > { %1694 = vtanh.f32 %v450_v15  ;;  %v1478_v15 = vld [vmem:[%s2429_s3 + $0x38] sm:$0xff] }
  0xc1   : > { %1696 = vtanh.f32 %v447_v53 }
  0xc2   : > { %1698 = vtanh.f32 %v448_v54  ;;  %v522_v34 = vpop.permute.xlu1 %521  ;;  %v502_v57 = vpop.permute.xlu0 %501  ;;  %v1479_v54 = vld [vmem:[%s2429_s3 + $0x40] sm:$0xff] }
  0xc3   : > { %v1689_v55 = vpop.eup %1688 }
  0xc4   : > { %v1691_v16 = vpop.eup %1690  ;;  %566 = vmatpush.msra.mxu0 %v1689_v55  ;;  %1612 = vmatpush.msra.mxu2 %v1689_v55  ;;  %v1480_v55 = vld [vmem:[%s2429_s3 + $0x48] sm:$0xff] }
  0xc5   : > { %v1693_v17 = vpop.eup %1692  ;;  %604 = vmatpush.msra.mxu1 %v1691_v16  ;;  %1619 = vmatpush.msra.mxu3 %v1691_v16  ;;  %v1481_v16 = vld [vmem:[%s2429_s3 + $0x50] sm:$0xff] }
  0xc6   : > { %v1695_v18 = vpop.eup %1694  ;;  %567 = vmatpush.msra.mxu0 %v1693_v17  ;;  %1613 = vmatpush.msra.mxu2 %v1693_v17  ;;  %v1482_v17 = vld [vmem:[%s2429_s3 + $0x58] sm:$0xff] }
  0xc7   : > { %v1697_v19 = vpop.eup %1696  ;;  %605 = vmatpush.msra.mxu1 %v1695_v18  ;;  %1620 = vmatpush.msra.mxu3 %v1695_v18  ;;  %v1483_v18 = vld [vmem:[%s2429_s3 + $0x60] sm:$0xff] }
  0xc8   : > { %v1699_v22 = vpop.eup %1698  ;;  %568 = vmatpush.msra.mxu0 %v1697_v19  ;;  %1614 = vmatpush.msra.mxu2 %v1697_v19  ;;  %v1484_v19 = vld [vmem:[%s2429_s3 + $0x68] sm:$0x3] }
  0xc9   : > { %606 = vmatpush.msra.mxu1 %v1699_v22  ;;  %1621 = vmatpush.msra.mxu3 %v1699_v22 }
  0xca   : > { %1463 = vmatmul.msk.f32.vlgmr.msra.gmra.mxu0 %vm524_vm1, %v475_v20  ;;  %1467 = vmatmul.msk.f32.vlgmr.msra.gmra.mxu2 %vm524_vm1, %v479_v21  ;;  %v512_v40 = vpop.permute.xlu1 %511 }
  0xcb   : > { %1471 = vmatmul.msk.f32.vlgmr.msra.gmra.mxu1 %vm524_vm1, %v475_v20  ;;  %1475 = vmatmul.msk.f32.vlgmr.msra.gmra.mxu3 %vm524_vm1, %v479_v21 }
  0xd2   : > { %1464 = vmatmul.msk.f32.gmra.mxu0 %vm524_vm1, %v476_v23  ;;  %1468 = vmatmul.msk.f32.gmra.mxu2 %vm524_vm1, %v480_v24  ;;  %v497_v60 = vpop.permute.xlu1 %496 }
  0xd3   : > { %1472 = vmatmul.msk.f32.gmra.mxu1 %vm524_vm1, %v476_v23  ;;  %1476 = vmatmul.msk.f32.gmra.mxu3 %vm524_vm1, %v480_v24 }
  0xda   : > { %1465 = vmatmul.msk.f32.gmra.mxu0 %vm524_vm1, %v477_v25  ;;  %1469 = vmatmul.msk.f32.gmra.mxu2 %vm524_vm1, %v481_v26 }
  0xdb   : > { %1473 = vmatmul.msk.f32.gmra.mxu1 %vm524_vm1, %v477_v25  ;;  %1477 = vmatmul.msk.f32.gmra.mxu3 %vm524_vm1, %v481_v26 }
  0xe2   : > { %1466 = vmatmul.msk.f32.gmra.mxu0 %vm524_vm1, %v478_v27 }
  0xe3   : > { %1474 = vmatmul.msk.f32.gmra.mxu1 %vm524_vm1, %v478_v27 }
 0x147   : > { %v570_v28 = vpop.f32.mrf.mxu0 }
 0x148   : > { %v608_v29 = vpop.f32.mrf.mxu1  ;;  %v571_v5 = vadd.f32 %v570_v28, %v492_v1 }
 0x149   : > { %v609_v7 = vadd.f32 %v608_v29, %v492_v1 }
 0x14d   : > { %v582_v30 = vpop.f32.mrf.mxu2 }
 0x14e   : > { %v620_v31 = vpop.f32.mrf.mxu3  ;;  %v583_v49 = vadd.f32 %v582_v30, %v512_v40  ;;  %v692_v30 = vpop.permute.xlu0 %691 }
 0x14f   : > { %v573_v32 = vpop.f32.mrf.mxu0  ;;  %v621_v51 = vadd.f32 %v620_v31, %v512_v40 }
 0x150   : > { %v611_v33 = vpop.f32.mrf.mxu1  ;;  %v574_v63 = vadd.f32 %v573_v32, %v497_v60 }
 0x151   : > { %v612_v2 = vadd.f32 %v611_v33, %v497_v60  ;;  %v687_v33 = vpop.permute.xlu1 %686 }
 0x155   : > { %v585_v36 = vpop.f32.mrf.mxu2 }
 0x156   : > { %v623_v37 = vpop.f32.mrf.mxu3  ;;  %v586_v43 = vadd.f32 %v585_v36, %v517_v35 }
 0x157   : > { %v576_v38 = vpop.f32.mrf.mxu0  ;;  %v624_v46 = vadd.f32 %v623_v37, %v517_v35  ;;  %v677_v35 = vpop.permute.xlu0 %676 }
 0x158   : > { %v614_v39 = vpop.f32.mrf.mxu1  ;;  %v577_v59 = vadd.f32 %v576_v38, %v502_v57 }
 0x159   : > { %v615_v61 = vadd.f32 %v614_v39, %v502_v57 }
 0x15d   : > { %v588_v42 = vpop.f32.mrf.mxu2 }
 0x15e   : > { %v589_v44 = vadd.f32 %v588_v42, %v522_v34  ;;  %v626_v45 = vpop.f32.mrf.mxu3 }
 0x15f   : > { %v627_v47 = vadd.f32 %v626_v45, %v522_v34  ;;  %v579_v48 = vpop.f32.mrf.mxu0  ;;  %v682_v34 = vpop.permute.xlu2 %681 }
 0x160   : > { %1700 = vtanh.f32 %v589_v44  ;;  %v617_v50 = vpop.f32.mrf.mxu1  ;;  %v580_v56 = vadd.f32 %v579_v48, %v507_v41  ;;  %v672_v45 = vpop.permute.xlu1 %671 }
 0x161   : > { %1702 = vtanh.f32 %v627_v47  ;;  %v618_v58 = vadd.f32 %v617_v50, %v507_v41  ;;  %v662_v57 = vpop.permute.xlu0 %661 }
 0x162   : > { %1704 = vtanh.f32 %v586_v43 }
 0x163   : > { %1706 = vtanh.f32 %v624_v46 }
 0x164   : > { %1708 = vtanh.f32 %v583_v49 }
 0x165   : > { %1710 = vtanh.f32 %v621_v51 }
 0x166   : > { %v1701_v62 = vpop.eup %1700  ;;  %1712 = vtanh.f32 %v580_v56 }
 0x167   : > { %v1703_v0 = vpop.eup %1702  ;;  %1714 = vtanh.f32 %v618_v58  ;;  %1492 = vmatpush.msk.msrb.mxu2 %vm546_vm0, %v1701_v62  ;;  %v667_v48 = vpop.permute.xlu2 %666 }
 0x168   : > { %v1705_v4 = vpop.eup %1704  ;;  %1716 = vtanh.f32 %v577_v59  ;;  %1500 = vmatpush.msk.msrb.mxu3 %vm546_vm0, %v1703_v0 }
 0x169   : > { %v1707_v6 = vpop.eup %1706  ;;  %1718 = vtanh.f32 %v615_v61  ;;  %731 = vmatpush.msrb.mxu2 %v1705_v4 }
 0x16a   : > { %v1709_v8 = vpop.eup %1708  ;;  %1720 = vtanh.f32 %v574_v63  ;;  %769 = vmatpush.msrb.mxu3 %v1707_v6 }
 0x16b   : > { %v1711_v9 = vpop.eup %1710  ;;  %1722 = vtanh.f32 %v612_v2  ;;  %732 = vmatpush.msrb.mxu2 %v1709_v8  ;;  %v1508_v8 = vld [vmem:[%s2429_s3 + $0x70] sm:$0xff] }
 0x16c   : > { %v1713_v10 = vpop.eup %1712  ;;  %1724 = vtanh.f32 %v571_v5  ;;  %770 = vmatpush.msrb.mxu3 %v1711_v9 }
 0x16d   : > { %v1715_v11 = vpop.eup %1714  ;;  %1726 = vtanh.f32 %v609_v7  ;;  %733 = vmatpush.msrb.mxu2 %v1713_v10 }
 0x16e   : > { %v1717_v12 = vpop.eup %1716  ;;  %771 = vmatpush.msrb.mxu3 %v1715_v11  ;;  %v1509_v11 = vld [vmem:[%s2429_s3 + $0x78] sm:$0xff] }
 0x16f   : > { %v1719_v13 = vpop.eup %1718  ;;  %734 = vmatpush.msrb.mxu2 %v1717_v12  ;;  %v1510_v12 = vld [vmem:[%s2429_s3 + $0x80] sm:$0xff] }
 0x170   : > { %v1721_v3 = vpop.eup %1720  ;;  %772 = vmatpush.msrb.mxu3 %v1719_v13  ;;  %v1511_v13 = vld [vmem:[%s2429_s3 + $0x88] sm:$0xff] }
 0x171   : > { %v1723_v14 = vpop.eup %1722  ;;  %735 = vmatpush.msrb.mxu2 %v1721_v3  ;;  %v1512_v3 = vld [vmem:[%s2429_s3 + $0x90] sm:$0xff] }
 0x172   : > { %v1725_v52 = vpop.eup %1724  ;;  %773 = vmatpush.msrb.mxu3 %v1723_v14  ;;  %v1513_v14 = vld [vmem:[%s2429_s3 + $0x98] sm:$0xff] }
 0x173   : > { %v1727_v53 = vpop.eup %1726  ;;  %736 = vmatpush.msrb.mxu2 %v1725_v52 }
 0x174   : > { %774 = vmatpush.msrb.mxu3 %v1727_v53  ;;  %1493 = vmatmul.msk.f32.vlgmr.msrb.gmra.mxu2 %vm524_vm1, %v1478_v15 }
 0x175   : > { %1501 = vmatmul.msk.f32.vlgmr.msrb.gmra.mxu3 %vm524_vm1, %v1478_v15  ;;  %v1514_v15 = vld [vmem:[%s2429_s3 + $0xa0] sm:$0x3] }
 0x17c   : > { %1494 = vmatmul.msk.f32.gmra.mxu2 %vm524_vm1, %v1479_v54 }
 0x17d   : > { %1502 = vmatmul.msk.f32.gmra.mxu3 %vm524_vm1, %v1479_v54 }
 0x184   : > { %1495 = vmatmul.msk.f32.gmra.mxu2 %vm524_vm1, %v1480_v55 }
 0x185   : > { %1503 = vmatmul.msk.f32.gmra.mxu3 %vm524_vm1, %v1480_v55 }
 0x18c   : > { %1496 = vmatmul.msk.f32.gmra.mxu2 %vm524_vm1, %v1481_v16 }
 0x18d   : > { %1504 = vmatmul.msk.f32.gmra.mxu3 %vm524_vm1, %v1481_v16 }
 0x194   : > { %1497 = vmatmul.msk.f32.gmra.mxu2 %vm524_vm1, %v1482_v17 }
 0x195   : > { %1505 = vmatmul.msk.f32.gmra.mxu3 %vm524_vm1, %v1482_v17 }
 0x19c   : > { %1498 = vmatmul.msk.f32.gmra.mxu2 %vm524_vm1, %v1483_v18 }
 0x19d   : > { %1506 = vmatmul.msk.f32.gmra.mxu3 %vm524_vm1, %v1483_v18 }
 0x1a4   : > { %1499 = vmatmul.msk.f32.gmra.mxu2 %vm524_vm1, %v1484_v19 }
 0x1a5   : > { %1507 = vmatmul.msk.f32.gmra.mxu3 %vm524_vm1, %v1484_v19 }
 0x1f7   : > { %v738_v20 = vpop.f32.mrf.mxu2 }
 0x1f8   : > { %v776_v21 = vpop.f32.mrf.mxu3  ;;  %v739_v60 = vadd.f32 %v738_v20, %v662_v57 }
 0x1f9   : > { %v777_v62 = vadd.f32 %v776_v21, %v662_v57 }
 0x1ff   : > { %v741_v22 = vpop.f32.mrf.mxu2 }
 0x200   : > { %v779_v23 = vpop.f32.mrf.mxu3  ;;  %v742_v51 = vadd.f32 %v741_v22, %v667_v48  ;;  %v860_v22 = vpop.permute.xlu1 %859 }
 0x201   : > { %v780_v58 = vadd.f32 %v779_v23, %v667_v48 }
 0x207   : > { %v744_v24 = vpop.f32.mrf.mxu2 }
 0x208   : > { %v782_v25 = vpop.f32.mrf.mxu3  ;;  %v745_v47 = vadd.f32 %v744_v24, %v672_v45 }
 0x209   : > { %v783_v49 = vadd.f32 %v782_v25, %v672_v45  ;;  %v855_v25 = vpop.permute.xlu2 %854 }
 0x20f   : > { %v747_v26 = vpop.f32.mrf.mxu2 }
 0x210   : > { %v785_v27 = vpop.f32.mrf.mxu3  ;;  %v748_v44 = vadd.f32 %v747_v26, %v677_v35  ;;  %v850_v26 = vpop.permute.xlu0 %849 }
 0x211   : > { %v786_v46 = vadd.f32 %v785_v27, %v677_v35  ;;  %v845_v27 = vpop.permute.xlu1 %844 }
 0x217   : > { %v750_v28 = vpop.f32.mrf.mxu2 }
 0x218   : > { %v788_v29 = vpop.f32.mrf.mxu3  ;;  %v751_v42 = vadd.f32 %v750_v28, %v682_v34 }
 0x219   : > { %v789_v43 = vadd.f32 %v788_v29, %v682_v34  ;;  %v830_v45 = vpop.permute.xlu1 %829 }
 0x21f   : > { %v753_v31 = vpop.f32.mrf.mxu2 }
 0x220   : > { %v791_v32 = vpop.f32.mrf.mxu3  ;;  %v754_v37 = vadd.f32 %v753_v31, %v687_v33 }
 0x221   : > { %v792_v40 = vadd.f32 %v791_v32, %v687_v33 }
 0x227   : > { %v756_v36 = vpop.f32.mrf.mxu2 }
 0x228   : > { %v757_v38 = vadd.f32 %v756_v36, %v692_v30  ;;  %v794_v39 = vpop.f32.mrf.mxu3 }
 0x229   : > { %v795_v41 = vadd.f32 %v794_v39, %v692_v30 }
 0x22a   : > { %1728 = vtanh.f32 %v757_v38 }
 0x22b   : > { %1730 = vtanh.f32 %v795_v41 }
 0x22c   : > { %1732 = vtanh.f32 %v754_v37  ;;  %v840_v37 = vpop.permute.xlu2 %839 }
 0x22d   : > { %1734 = vtanh.f32 %v792_v40  ;;  %v835_v40 = vpop.permute.xlu0 %834 }
 0x22e   : > { %1736 = vtanh.f32 %v751_v42 }
 0x22f   : > { %1738 = vtanh.f32 %v789_v43 }
 0x230   : > { %v1729_v50 = vpop.eup %1728  ;;  %1740 = vtanh.f32 %v748_v44 }
 0x231   : > { %v1731_v56 = vpop.eup %1730  ;;  %1742 = vtanh.f32 %v786_v46  ;;  %1522 = vmatpush.msk.msrb.mxu0 %vm546_vm0, %v1729_v50 }
 0x232   : > { %v1733_v59 = vpop.eup %1732  ;;  %1744 = vtanh.f32 %v745_v47  ;;  %1530 = vmatpush.msk.msrb.mxu1 %vm546_vm0, %v1731_v56 }
 0x233   : > { %v1735_v61 = vpop.eup %1734  ;;  %1746 = vtanh.f32 %v783_v49  ;;  %899 = vmatpush.msrb.mxu0 %v1733_v59 }
 0x234   : > { %v1737_v63 = vpop.eup %1736  ;;  %1748 = vtanh.f32 %v742_v51  ;;  %937 = vmatpush.msrb.mxu1 %v1735_v61 }
 0x235   : > { %v1739_v0 = vpop.eup %1738  ;;  %1750 = vtanh.f32 %v780_v58  ;;  %900 = vmatpush.msrb.mxu0 %v1737_v63  ;;  %v1538_v63 = vld [vmem:[%s2429_s3 + $0xa8] sm:$0xff] }
 0x236   : > { %v1741_v1 = vpop.eup %1740  ;;  %1752 = vtanh.f32 %v739_v60  ;;  %938 = vmatpush.msrb.mxu1 %v1739_v0 }
 0x237   : > { %v1743_v2 = vpop.eup %1742  ;;  %1754 = vtanh.f32 %v777_v62  ;;  %901 = vmatpush.msrb.mxu0 %v1741_v1 }
 0x238   : > { %v1745_v4 = vpop.eup %1744  ;;  %939 = vmatpush.msrb.mxu1 %v1743_v2  ;;  %v1539_v2 = vld [vmem:[%s2429_s3 + $0xb0] sm:$0xff] }
 0x239   : > { %v1747_v5 = vpop.eup %1746  ;;  %902 = vmatpush.msrb.mxu0 %v1745_v4  ;;  %v1540_v4 = vld [vmem:[%s2429_s3 + $0xb8] sm:$0xff] }
 0x23a   : > { %v1749_v6 = vpop.eup %1748  ;;  %940 = vmatpush.msrb.mxu1 %v1747_v5  ;;  %v1541_v5 = vld [vmem:[%s2429_s3 + $0xc0] sm:$0xff] }
 0x23b   : > { %v1751_v7 = vpop.eup %1750  ;;  %903 = vmatpush.msrb.mxu0 %v1749_v6  ;;  %v1542_v6 = vld [vmem:[%s2429_s3 + $0xc8] sm:$0xff] }
 0x23c   : > { %v1753_v9 = vpop.eup %1752  ;;  %941 = vmatpush.msrb.mxu1 %v1751_v7  ;;  %v1543_v7 = vld [vmem:[%s2429_s3 + $0xd0] sm:$0xff] }
 0x23d   : > { %v1755_v10 = vpop.eup %1754  ;;  %904 = vmatpush.msrb.mxu0 %v1753_v9 }
 0x23e   : > { %942 = vmatpush.msrb.mxu1 %v1755_v10  ;;  %1523 = vmatmul.msk.f32.vlgmr.msrb.gmra.mxu0 %vm524_vm1, %v1508_v8 }
 0x23f   : > { %1531 = vmatmul.msk.f32.vlgmr.msrb.gmra.mxu1 %vm524_vm1, %v1508_v8  ;;  %v1544_v8 = vld [vmem:[%s2429_s3 + $0xd8] sm:$0x3] }
 0x246   : > { %1524 = vmatmul.msk.f32.gmra.mxu0 %vm524_vm1, %v1509_v11 }
 0x247   : > { %1532 = vmatmul.msk.f32.gmra.mxu1 %vm524_vm1, %v1509_v11 }
 0x24e   : > { %1525 = vmatmul.msk.f32.gmra.mxu0 %vm524_vm1, %v1510_v12 }
 0x24f   : > { %1533 = vmatmul.msk.f32.gmra.mxu1 %vm524_vm1, %v1510_v12 }
 0x256   : > { %1526 = vmatmul.msk.f32.gmra.mxu0 %vm524_vm1, %v1511_v13 }
 0x257   : > { %1534 = vmatmul.msk.f32.gmra.mxu1 %vm524_vm1, %v1511_v13 }
 0x25e   : > { %1527 = vmatmul.msk.f32.gmra.mxu0 %vm524_vm1, %v1512_v3 }
 0x25f   : > { %1535 = vmatmul.msk.f32.gmra.mxu1 %vm524_vm1, %v1512_v3 }
 0x266   : > { %1528 = vmatmul.msk.f32.gmra.mxu0 %vm524_vm1, %v1513_v14 }
 0x267   : > { %1536 = vmatmul.msk.f32.gmra.mxu1 %vm524_vm1, %v1513_v14 }
 0x26e   : > { %1529 = vmatmul.msk.f32.gmra.mxu0 %vm524_vm1, %v1514_v15 }
 0x26f   : > { %1537 = vmatmul.msk.f32.gmra.mxu1 %vm524_vm1, %v1514_v15 }
 0x2bb   : > { %v906_v52 = vpop.f32.mrf.mxu0 }
 0x2bc   : > { %v944_v53 = vpop.f32.mrf.mxu1  ;;  %v907_v48 = vadd.f32 %v906_v52, %v830_v45 }
 0x2bd   : > { %v945_v50 = vadd.f32 %v944_v53, %v830_v45 }
 0x2c3   : > { %v909_v54 = vpop.f32.mrf.mxu0 }
 0x2c4   : > { %v947_v55 = vpop.f32.mrf.mxu1  ;;  %v910_v43 = vadd.f32 %v909_v54, %v835_v40  ;;  %v1028_v54 = vpop.permute.xlu2 %1027 }
 0x2c5   : > { %v948_v46 = vadd.f32 %v947_v55, %v835_v40 }
 0x2cb   : > { %v912_v16 = vpop.f32.mrf.mxu0 }
 0x2cc   : > { %v950_v17 = vpop.f32.mrf.mxu1  ;;  %v913_v39 = vadd.f32 %v912_v16, %v840_v37 }
 0x2cd   : > { %v951_v41 = vadd.f32 %v950_v17, %v840_v37  ;;  %v1023_v17 = vpop.permute.xlu0 %1022 }
 0x2d3   : > { %v915_v18 = vpop.f32.mrf.mxu0 }
 0x2d4   : > { %v953_v19 = vpop.f32.mrf.mxu1  ;;  %v916_v36 = vadd.f32 %v915_v18, %v845_v27  ;;  %v1018_v18 = vpop.permute.xlu1 %1017 }
 0x2d5   : > { %v954_v38 = vadd.f32 %v953_v19, %v845_v27  ;;  %v1013_v19 = vpop.permute.xlu2 %1012 }
 0x2db   : > { %v918_v20 = vpop.f32.mrf.mxu0 }
 0x2dc   : > { %v956_v21 = vpop.f32.mrf.mxu1  ;;  %v919_v34 = vadd.f32 %v918_v20, %v850_v26 }
 0x2dd   : > { %v957_v35 = vadd.f32 %v956_v21, %v850_v26  ;;  %v998_v37 = vpop.permute.xlu2 %997 }
 0x2e3   : > { %v921_v23 = vpop.f32.mrf.mxu0 }
 0x2e4   : > { %v959_v24 = vpop.f32.mrf.mxu1  ;;  %v922_v29 = vadd.f32 %v921_v23, %v855_v25 }
 0x2e5   : > { %v960_v32 = vadd.f32 %v959_v24, %v855_v25 }
 0x2eb   : > { %v924_v28 = vpop.f32.mrf.mxu0 }
 0x2ec   : > { %v925_v30 = vadd.f32 %v924_v28, %v860_v22  ;;  %v962_v31 = vpop.f32.mrf.mxu1 }
 0x2ed   : > { %v963_v33 = vadd.f32 %v962_v31, %v860_v22 }
 0x2ee   : > { %1756 = vtanh.f32 %v925_v30 }
 0x2ef   : > { %1758 = vtanh.f32 %v963_v33 }
 0x2f0   : > { %1760 = vtanh.f32 %v922_v29  ;;  %v1008_v29 = vpop.permute.xlu0 %1007 }
 0x2f1   : > { %1762 = vtanh.f32 %v960_v32  ;;  %v1003_v32 = vpop.permute.xlu1 %1002 }
 0x2f2   : > { %1764 = vtanh.f32 %v919_v34 }
 0x2f3   : > { %1766 = vtanh.f32 %v957_v35 }
 0x2f4   : > { %v1757_v42 = vpop.eup %1756  ;;  %1768 = vtanh.f32 %v916_v36 }
 0x2f5   : > { %v1759_v44 = vpop.eup %1758  ;;  %1770 = vtanh.f32 %v954_v38  ;;  %1552 = vmatpush.msk.msra.mxu2 %vm546_vm0, %v1757_v42 }
 0x2f6   : > { %v1761_v47 = vpop.eup %1760  ;;  %1772 = vtanh.f32 %v913_v39  ;;  %1560 = vmatpush.msk.msra.mxu3 %vm546_vm0, %v1759_v44 }
 0x2f7   : > { %v1763_v49 = vpop.eup %1762  ;;  %1774 = vtanh.f32 %v951_v41  ;;  %1067 = vmatpush.msra.mxu2 %v1761_v47 }
 0x2f8   : > { %v1765_v51 = vpop.eup %1764  ;;  %1776 = vtanh.f32 %v910_v43  ;;  %1105 = vmatpush.msra.mxu3 %v1763_v49 }
 0x2f9   : > { %v1767_v56 = vpop.eup %1766  ;;  %1778 = vtanh.f32 %v948_v46  ;;  %1068 = vmatpush.msra.mxu2 %v1765_v51  ;;  %v1568_v51 = vld [vmem:[%s2429_s3 + $0xe0] sm:$0xff] }
 0x2fa   : > { %v1769_v57 = vpop.eup %1768  ;;  %1780 = vtanh.f32 %v907_v48  ;;  %1106 = vmatpush.msra.mxu3 %v1767_v56 }
 0x2fb   : > { %v1771_v58 = vpop.eup %1770  ;;  %1782 = vtanh.f32 %v945_v50  ;;  %1069 = vmatpush.msra.mxu2 %v1769_v57 }
 0x2fc   : > { %v1773_v59 = vpop.eup %1772  ;;  %1107 = vmatpush.msra.mxu3 %v1771_v58  ;;  %v1569_v58 = vld [vmem:[%s2429_s3 + $0xe8] sm:$0xff] }
 0x2fd   : > { %v1775_v60 = vpop.eup %1774  ;;  %1070 = vmatpush.msra.mxu2 %v1773_v59  ;;  %v1570_v59 = vld [vmem:[%s2429_s3 + $0xf0] sm:$0xff] }
 0x2fe   : > { %v1777_v61 = vpop.eup %1776  ;;  %1108 = vmatpush.msra.mxu3 %v1775_v60  ;;  %v1571_v60 = vld [vmem:[%s2429_s3 + $0xf8] sm:$0xff] }
 0x2ff   : > { %v1779_v62 = vpop.eup %1778  ;;  %1071 = vmatpush.msra.mxu2 %v1777_v61  ;;  %v1572_v61 = vld [vmem:[%s2429_s3 + $0x100] sm:$0xff] }
 0x300   : > { %v1781_v0 = vpop.eup %1780  ;;  %1109 = vmatpush.msra.mxu3 %v1779_v62  ;;  %v1573_v62 = vld [vmem:[%s2429_s3 + $0x108] sm:$0xff] }
 0x301   : > { %v1783_v1 = vpop.eup %1782  ;;  %1072 = vmatpush.msra.mxu2 %v1781_v0 }
 0x302   : > { %1110 = vmatpush.msra.mxu3 %v1783_v1  ;;  %1553 = vmatmul.msk.f32.vlgmr.msra.gmra.mxu2 %vm524_vm1, %v1538_v63 }
 0x303   : > { %1561 = vmatmul.msk.f32.vlgmr.msra.gmra.mxu3 %vm524_vm1, %v1538_v63  ;;  %v1574_v63 = vld [vmem:[%s2429_s3 + $0x110] sm:$0x3] }
 0x30a   : > { %1554 = vmatmul.msk.f32.gmra.mxu2 %vm524_vm1, %v1539_v2 }
 0x30b   : > { %1562 = vmatmul.msk.f32.gmra.mxu3 %vm524_vm1, %v1539_v2 }
 0x312   : > { %1555 = vmatmul.msk.f32.gmra.mxu2 %vm524_vm1, %v1540_v4 }
 0x313   : > { %1563 = vmatmul.msk.f32.gmra.mxu3 %vm524_vm1, %v1540_v4 }
 0x31a   : > { %1556 = vmatmul.msk.f32.gmra.mxu2 %vm524_vm1, %v1541_v5 }
 0x31b   : > { %1564 = vmatmul.msk.f32.gmra.mxu3 %vm524_vm1, %v1541_v5 }
 0x322   : > { %1557 = vmatmul.msk.f32.gmra.mxu2 %vm524_vm1, %v1542_v6 }
 0x323   : > { %1565 = vmatmul.msk.f32.gmra.mxu3 %vm524_vm1, %v1542_v6 }
 0x32a   : > { %1558 = vmatmul.msk.f32.gmra.mxu2 %vm524_vm1, %v1543_v7 }
 0x32b   : > { %1566 = vmatmul.msk.f32.gmra.mxu3 %vm524_vm1, %v1543_v7 }
 0x332   : > { %1559 = vmatmul.msk.f32.gmra.mxu2 %vm524_vm1, %v1544_v8 }
 0x333   : > { %1567 = vmatmul.msk.f32.gmra.mxu3 %vm524_vm1, %v1544_v8 }
 0x385   : > { %v1074_v9 = vpop.f32.mrf.mxu2 }
 0x386   : > { %v1112_v10 = vpop.f32.mrf.mxu3  ;;  %v1075_v40 = vadd.f32 %v1074_v9, %v998_v37 }
 0x387   : > { %v1113_v42 = vadd.f32 %v1112_v10, %v998_v37 }
 0x38d   : > { %v1077_v11 = vpop.f32.mrf.mxu2 }
 0x38e   : > { %v1115_v12 = vpop.f32.mrf.mxu3  ;;  %v1078_v35 = vadd.f32 %v1077_v11, %v1003_v32  ;;  %v1196_v11 = vpop.permute.xlu0 %1195 }
 0x38f   : > { %v1116_v38 = vadd.f32 %v1115_v12, %v1003_v32 }
 0x395   : > { %v1080_v13 = vpop.f32.mrf.mxu2 }
 0x396   : > { %v1118_v3 = vpop.f32.mrf.mxu3  ;;  %v1081_v31 = vadd.f32 %v1080_v13, %v1008_v29 }
 0x397   : > { %v1119_v33 = vadd.f32 %v1118_v3, %v1008_v29  ;;  %v1191_v3 = vpop.permute.xlu1 %1190 }
 0x39d   : > { %v1083_v14 = vpop.f32.mrf.mxu2 }
 0x39e   : > { %v1121_v15 = vpop.f32.mrf.mxu3  ;;  %v1084_v28 = vadd.f32 %v1083_v14, %v1013_v19  ;;  %v1186_v14 = vpop.permute.xlu2 %1185 }
 0x39f   : > { %v1122_v30 = vadd.f32 %v1121_v15, %v1013_v19  ;;  %v1181_v15 = vpop.permute.xlu0 %1180 }
 0x3a5   : > { %v1086_v52 = vpop.f32.mrf.mxu2 }
 0x3a6   : > { %v1124_v53 = vpop.f32.mrf.mxu3  ;;  %v1087_v26 = vadd.f32 %v1086_v52, %v1018_v18 }
 0x3a7   : > { %v1125_v27 = vadd.f32 %v1124_v53, %v1018_v18  ;;  %v1166_v29 = vpop.permute.xlu0 %1165 }
 0x3ad   : > { %v1089_v55 = vpop.f32.mrf.mxu2 }
 0x3ae   : > { %v1127_v16 = vpop.f32.mrf.mxu3  ;;  %v1090_v21 = vadd.f32 %v1089_v55, %v1023_v17 }
 0x3af   : > { %v1128_v24 = vadd.f32 %v1127_v16, %v1023_v17 }
 0x3b5   : > { %v1092_v20 = vpop.f32.mrf.mxu2 }
 0x3b6   : > { %v1093_v22 = vadd.f32 %v1092_v20, %v1028_v54  ;;  %v1130_v23 = vpop.f32.mrf.mxu3 }
 0x3b7   : > { %v1131_v25 = vadd.f32 %v1130_v23, %v1028_v54 }
 0x3b8   : > { %1784 = vtanh.f32 %v1093_v22 }
 0x3b9   : > { %1786 = vtanh.f32 %v1131_v25 }
 0x3ba   : > { %1788 = vtanh.f32 %v1090_v21  ;;  %v1176_v21 = vpop.permute.xlu1 %1175 }
 0x3bb   : > { %1790 = vtanh.f32 %v1128_v24  ;;  %v1171_v24 = vpop.permute.xlu2 %1170 }
 0x3bc   : > { %1792 = vtanh.f32 %v1087_v26 }
 0x3bd   : > { %1794 = vtanh.f32 %v1125_v27 }
 0x3be   : > { %v1785_v34 = vpop.eup %1784  ;;  %1796 = vtanh.f32 %v1084_v28 }
 0x3bf   : > { %v1787_v36 = vpop.eup %1786  ;;  %1798 = vtanh.f32 %v1122_v30  ;;  %1582 = vmatpush.msk.msra.mxu0 %vm546_vm0, %v1785_v34 }
 0x3c0   : > { %v1789_v39 = vpop.eup %1788  ;;  %1800 = vtanh.f32 %v1081_v31  ;;  %1590 = vmatpush.msk.msra.mxu1 %vm546_vm0, %v1787_v36 }
 0x3c1   : > { %v1791_v41 = vpop.eup %1790  ;;  %1802 = vtanh.f32 %v1119_v33  ;;  %1235 = vmatpush.msra.mxu0 %v1789_v39 }
 0x3c2   : > { %v1793_v43 = vpop.eup %1792  ;;  %1804 = vtanh.f32 %v1078_v35  ;;  %1273 = vmatpush.msra.mxu1 %v1791_v41 }
 0x3c3   : > { %v1795_v44 = vpop.eup %1794  ;;  %1806 = vtanh.f32 %v1116_v38  ;;  %1236 = vmatpush.msra.mxu0 %v1793_v43  ;;  %v1315_v43 = vld [vmem:[%s2431_s5] sm:$0x7] }
 0x3c4   : > { %v1797_v45 = vpop.eup %1796  ;;  %1808 = vtanh.f32 %v1075_v40  ;;  %1274 = vmatpush.msra.mxu1 %v1795_v44 }
 0x3c5   : > { %v1799_v46 = vpop.eup %1798  ;;  %1810 = vtanh.f32 %v1113_v42  ;;  %1237 = vmatpush.msra.mxu0 %v1797_v45 }
 0x3c6   : > { %v1801_v47 = vpop.eup %1800  ;;  %1275 = vmatpush.msra.mxu1 %v1799_v46  ;;  %v1320_v46 = vpop.permute.xlu1 %1319 }
 0x3c7   : > { %v1803_v48 = vpop.eup %1802  ;;  %1238 = vmatpush.msra.mxu0 %v1801_v47 }
 0x3c8   : > { %v1805_v49 = vpop.eup %1804  ;;  %1276 = vmatpush.msra.mxu1 %v1803_v48 }
 0x3c9   : > { %v1807_v50 = vpop.eup %1806  ;;  %1239 = vmatpush.msra.mxu0 %v1805_v49 }
 0x3ca   : > { %v1809_v56 = vpop.eup %1808  ;;  %1277 = vmatpush.msra.mxu1 %v1807_v50 }
 0x3cb   : > { %v1811_v57 = vpop.eup %1810  ;;  %1240 = vmatpush.msra.mxu0 %v1809_v56 }
 0x3cc   : > { %1278 = vmatpush.msra.mxu1 %v1811_v57  ;;  %1583 = vmatmul.msk.f32.vlgmr.msra.gmra.mxu0 %vm524_vm1, %v1568_v51 }
 0x3cd   : > { %1591 = vmatmul.msk.f32.vlgmr.msra.gmra.mxu1 %vm524_vm1, %v1568_v51 }
 0x3d4   : > { %1584 = vmatmul.msk.f32.gmra.mxu0 %vm524_vm1, %v1569_v58 }
 0x3d5   : > { %1592 = vmatmul.msk.f32.gmra.mxu1 %vm524_vm1, %v1569_v58 }
 0x3dc   : > { %1585 = vmatmul.msk.f32.gmra.mxu0 %vm524_vm1, %v1570_v59 }
 0x3dd   : > { %1593 = vmatmul.msk.f32.gmra.mxu1 %vm524_vm1, %v1570_v59 }
 0x3e4   : > { %1586 = vmatmul.msk.f32.gmra.mxu0 %vm524_vm1, %v1571_v60 }
 0x3e5   : > { %1594 = vmatmul.msk.f32.gmra.mxu1 %vm524_vm1, %v1571_v60 }
 0x3ec   : > { %1587 = vmatmul.msk.f32.gmra.mxu0 %vm524_vm1, %v1572_v61 }
 0x3ed   : > { %1595 = vmatmul.msk.f32.gmra.mxu1 %vm524_vm1, %v1572_v61 }
 0x3f4   : > { %1588 = vmatmul.msk.f32.gmra.mxu0 %vm524_vm1, %v1573_v62 }
 0x3f5   : > { %1596 = vmatmul.msk.f32.gmra.mxu1 %vm524_vm1, %v1573_v62 }
 0x3fc   : > { %1589 = vmatmul.msk.f32.gmra.mxu0 %vm524_vm1, %v1574_v63 }
 0x3fd   : > { %1597 = vmatmul.msk.f32.gmra.mxu1 %vm524_vm1, %v1574_v63 }
 0x449   : > { %v1242_v0 = vpop.f32.mrf.mxu0 }
 0x44a   : > { %v1280_v1 = vpop.f32.mrf.mxu1  ;;  %v1243_v32 = vadd.f32 %v1242_v0, %v1166_v29 }
 0x44b   : > { %v1281_v34 = vadd.f32 %v1280_v1, %v1166_v29 }
 0x451   : > { %v1245_v2 = vpop.f32.mrf.mxu0 }
 0x452   : > { %v1283_v4 = vpop.f32.mrf.mxu1  ;;  %v1246_v27 = vadd.f32 %v1245_v2, %v1171_v24 }
 0x453   : > { %v1284_v30 = vadd.f32 %v1283_v4, %v1171_v24 }
 0x459   : > { %v1248_v5 = vpop.f32.mrf.mxu0 }
 0x45a   : > { %v1286_v6 = vpop.f32.mrf.mxu1  ;;  %v1249_v23 = vadd.f32 %v1248_v5, %v1176_v21 }
 0x45b   : > { %v1287_v25 = vadd.f32 %v1286_v6, %v1176_v21 }
 0x461   : > { %v1251_v7 = vpop.f32.mrf.mxu0 }
 0x462   : > { %v1289_v8 = vpop.f32.mrf.mxu1  ;;  %v1252_v20 = vadd.f32 %v1251_v7, %v1181_v15 }
 0x463   : > { %v1290_v22 = vadd.f32 %v1289_v8, %v1181_v15 }
 0x469   : > { %v1254_v9 = vpop.f32.mrf.mxu0 }
 0x46a   : > { %v1292_v10 = vpop.f32.mrf.mxu1  ;;  %v1255_v18 = vadd.f32 %v1254_v9, %v1186_v14 }
 0x46b   : > { %v1293_v19 = vadd.f32 %v1292_v10, %v1186_v14 }
 0x471   : > { %v1257_v12 = vpop.f32.mrf.mxu0 }
 0x472   : > { %v1295_v13 = vpop.f32.mrf.mxu1  ;;  %v1258_v53 = vadd.f32 %v1257_v12, %v1191_v3 }
 0x473   : > { %v1296_v16 = vadd.f32 %v1295_v13, %v1191_v3 }
 0x479   : > { %v1260_v52 = vpop.f32.mrf.mxu0 }
 0x47a   : > { %v1261_v54 = vadd.f32 %v1260_v52, %v1196_v11  ;;  %v1298_v55 = vpop.f32.mrf.mxu1 }
 0x47b   : > { %v1299_v17 = vadd.f32 %v1298_v55, %v1196_v11 }
 0x47c   : > { %1812 = vtanh.f32 %v1261_v54 }
 0x47d   : > { %1814 = vtanh.f32 %v1299_v17 }
 0x47e   : > { %1816 = vtanh.f32 %v1258_v53 }
 0x47f   : > { %1818 = vtanh.f32 %v1296_v16 }
 0x480   : > { %1820 = vtanh.f32 %v1255_v18 }
 0x481   : > { %1822 = vtanh.f32 %v1293_v19 }
 0x482   : > { %v1813_v26 = vpop.eup %1812  ;;  %1824 = vtanh.f32 %v1252_v20 }
 0x483   : > { %v1815_v28 = vpop.eup %1814  ;;  %1826 = vtanh.f32 %v1290_v22  ;;  %1598 = vmatpush.msk.msrb.mxu2 %vm546_vm0, %v1813_v26 }
 0x484   : > { %v1817_v31 = vpop.eup %1816  ;;  %1828 = vtanh.f32 %v1249_v23  ;;  %1600 = vmatpush.msk.msrb.mxu3 %vm546_vm0, %v1815_v28 }
 0x485   : > { %v1819_v33 = vpop.eup %1818  ;;  %1830 = vtanh.f32 %v1287_v25  ;;  %1341 = vmatpush.msrb.mxu2 %v1817_v31 }
 0x486   : > { %v1821_v35 = vpop.eup %1820  ;;  %1832 = vtanh.f32 %v1246_v27  ;;  %1361 = vmatpush.msrb.mxu3 %v1819_v33 }
 0x487   : > { %v1823_v36 = vpop.eup %1822  ;;  %1834 = vtanh.f32 %v1284_v30  ;;  %1342 = vmatpush.msrb.mxu2 %v1821_v35 }
 0x488   : > { %v1825_v37 = vpop.eup %1824  ;;  %1836 = vtanh.f32 %v1243_v32  ;;  %1362 = vmatpush.msrb.mxu3 %v1823_v36 }
 0x489   : > { %v1827_v38 = vpop.eup %1826  ;;  %1838 = vtanh.f32 %v1281_v34  ;;  %1343 = vmatpush.msrb.mxu2 %v1825_v37 }
 0x48a   : > { %v1829_v39 = vpop.eup %1828  ;;  %1363 = vmatpush.msrb.mxu3 %v1827_v38 }
 0x48b   : > { %v1831_v40 = vpop.eup %1830  ;;  %1344 = vmatpush.msrb.mxu2 %v1829_v39 }
 0x48c   : > { %v1833_v41 = vpop.eup %1832  ;;  %1364 = vmatpush.msrb.mxu3 %v1831_v40 }
 0x48d   : > { %v1835_v42 = vpop.eup %1834  ;;  %1345 = vmatpush.msrb.mxu2 %v1833_v41 }
 0x48e   : > { %v1837_v44 = vpop.eup %1836  ;;  %1365 = vmatpush.msrb.mxu3 %v1835_v42 }
 0x48f   : > { %v1839_v45 = vpop.eup %1838  ;;  %1346 = vmatpush.msrb.mxu2 %v1837_v44 }
 0x490   : > { %1366 = vmatpush.msrb.mxu3 %v1839_v45  ;;  %1599 = vmatmul.msk.f32.vlgmr.msrb.gmra.mxu2 %vm524_vm1, %v1315_v43 }
 0x491   : > { %1601 = vmatmul.msk.f32.vlgmr.msrb.gmra.mxu3 %vm524_vm1, %v1315_v43 }
 0x513   : > { %v1348_v47 = vpop.f32.mrf.mxu2 }
 0x514   : > { %v1368_v48 = vpop.f32.mrf.mxu3  ;;  %v1349_v50 = vadd.f32 %v1348_v47, %v1320_v46 }
 0x515   : > { %v1369_v49 = vadd.f32 %v1368_v48, %v1320_v46 }
 0x517   : > { %v1373_v51 = vrot.slane %v1369_v49, 4 }
 0x519   : > { %v1375_v56 = vsel %vm1374_vm2, %v1349_v50, %v1373_v51 }
 0x51a   : > { %1377 = vst [vmem:[%s272_s15] sm:$0x77] %v1375_v56 }
 0x51b   : > { %1867 = shalt.err (!%p1864_p3)
}
 0x51c   : > { %1622 = dma.vmem_to_hbm [thread:$0]  (%p1984_p5), %s1393_s16, 128, %s1395_s13, %s1379_s28  }
 0x51d PF: > { %p1628_p4 = scmp.ge.s32.totalorder %s1902_s27, 2  ;;  %s1406_s22 = sand.u32 1, %s1890_s24  }
 0x51e   : > { %s1407_s8 = scalar_lea.sflag [#allocation3], %s1406_s22 }
 0x51f   : > { %p1625_p7 = pnand %p1628_p4, %p1988_p6 }
 0x521   : > { %p1626_p8 = pneg %p1625_p7 }
 0x523   : > { %1885 = dma.done.wait (%p1626_p8), %s1407_s8, 128  }
 0x524   : > { %1887 = vsyncadd (%p1626_p8), %s1407_s8, 4294967168  ;;  %p17_p9 = scmp.ge.s32.totalorder %s1971_s30, 4   ;;  %s2436_s24 = smov %s1894_s25 }
 0x525   : > { %s2437_s25 = smov %s1898_s26  ;;  %s2438_s26 = smov %s1982_s10 }
 0x526   : > { %s2439_s27 = smov %s1971_s30  ;;  %19 = sbr.rel (!%p17_p9) target bundleno = 3 (0x3), region = 92 }
 0x52b   :  { %1413 = vsyncpa [#allocation3], 1 }
 0x52c   :  { %1415 = vsyncpa [#allocation3 + $0x1], 1 }

</bundles_post_ra>
